<compile_context>
chip_gen: v6e
topology: v6e:2x2x1
jax: 0.10.0
libtpu: 0.0.40
codegen_flags: <defaults>
</compile_context>

<pallas_src>
import functools

import jax
import jax.numpy as jnp
from jax.experimental import pallas as pl
from jax.experimental.pallas import tpu as pltpu


def _round_up(x: int, m: int) -> int:
    return ((x + m - 1) // m) * m


def multifc_kernel(item_rep_ref, user_rep_ref, item_emb_ref, user_emb_ref,
                   w_ref, b_ref, out_ref):
    """Streaming MultiFC tile: sigmoid(rep . w_eff + b_eff) for block_b lanes.

    Activations arrive transposed (H, block_b) in bf16 so batch is the lane
    axis; w_ref is the folded (3H, 1) f32 weight column; b_ref is a (1,) f32
    SMEM scalar.  Output block is a lane-dense (1, block_b) f32 row.
    """
    H = item_rep_ref.shape[0]
    f32 = jnp.float32

    # Elementwise math in f32 on the VPU (v5e has no bf16 VALU); the casts fuse
    # with the loads and the VALU has large slack in this mem-bound kernel.
    item_rep = item_rep_ref[...].astype(f32)                    # (H, Bt)
    user_rep = user_rep_ref[...].astype(f32)                    # (H, Bt)
    elm = item_emb_ref[...].astype(f32) * user_emb_ref[...].astype(f32)

    # Static, sublane-aligned views of the folded weight column (H = 32).
    w_a = w_ref[0:H, :]                                         # (H, 1)
    w_b = w_ref[H:2 * H, :]
    w_c = w_ref[2 * H:3 * H, :]

    # rep . w_eff  ==  sum_h item_rep*w_a + user_rep*w_b + elm*w_c  (per lane).
    acc = item_rep * w_a + user_rep * w_b + elm * w_c           # (H, Bt)
    logits = jnp.sum(acc, axis=0, keepdims=True) + b_ref[0]     # (1, Bt)

    # Unmasked, lane-dense store.
    out_ref[...] = jax.nn.sigmoid(logits).astype(out_ref.dtype)


@functools.partial(jax.jit, static_argnames=("block_b",))
def multifc_forward(item_rep, user_rep, item_index, user_index,
                    item_emb_table, user_emb_table,
                    w1, b1, w2, b2, w3, b3, *, block_b=2048):
    """Embedding gather + affine fold (XLA glue) + streaming Pallas kernel."""
    # TODO(synk): gather stays in XLA; fusing it in-kernel would need scalar
    # prefetch of the indices plus VMEM-resident embedding tables.
    item_emb = jnp.take(item_emb_table, item_index, axis=0)     # (B, H)
    user_emb = jnp.take(user_emb_table, user_index, axis=0)     # (B, H)

    B, H = item_rep.shape
    K = w2.shape[1]

    # --- Fold the affine MLP (no inter-layer nonlinearity in the module) -----
    # w_eff = W1 @ W2 @ w3  (3H, 1);  b_eff = b1@W2@w3 + b2@w3 + b3  (scalar).
    w3c = w3.reshape(K, 1).astype(jnp.float32)                  # (K, 1)
    v = w2.astype(jnp.float32) @ w3c                            # (2K, 1)
    w_eff = w1.astype(jnp.float32) @ v                          # (3H, 1)
    b_eff = ((b1.astype(jnp.float32) @ v).reshape(1)
             + (b2.astype(jnp.float32) @ w3c).reshape(1)
             + b3.astype(jnp.float32).reshape(1))               # (1,) SMEM scalar

    # --- Batch tiling: batch lives on the lane axis (128-multiple blocks) ----
    block_b = _round_up(max(int(block_b), 128), 128)
    lanes = _round_up(B, 128)
    block_b = min(block_b, lanes)
    # v7x has 2 TensorCores: keep >= 2 "parallel" grid steps when B allows it.
    if lanes >= 256 and lanes // block_b < 2:
        block_b = _round_up(lanes // 2, 128)
    B_pad = _round_up(lanes, block_b)
    grid = (B_pad // block_b,)

    def prep(x):
        # (B, H) f32 -> (H, B_pad) bf16; cast + transpose + pad fuse into one
        # XLA copy (same bytes as the bf16 cast alone; halves kernel HBM reads).
        x = x.astype(jnp.bfloat16).T
        if B_pad != B:
            x = jnp.pad(x, ((0, 0), (0, B_pad - B)))
        return x

    item_rep_t = prep(item_rep)
    user_rep_t = prep(user_rep)
    item_emb_t = prep(item_emb)
    user_emb_t = prep(user_emb)

    act_spec = lambda: pl.BlockSpec((H, block_b), lambda i: (0, i))

    out_row = pl.pallas_call(
        multifc_kernel,
        out_shape=jax.ShapeDtypeStruct((1, B_pad), jnp.float32),
        grid=grid,
        in_specs=[
            act_spec(), act_spec(), act_spec(), act_spec(),
            pl.BlockSpec((3 * H, 1), lambda i: (0, 0)),          # w_eff (VMEM-resident)
            pl.BlockSpec(memory_space=pltpu.MemorySpace.SMEM),   # b_eff scalar
        ],
        out_specs=pl.BlockSpec((1, block_b), lambda i: (0, i)),
        compiler_params=pltpu.CompilerParams(
            dimension_semantics=("parallel",),
            vmem_limit_bytes=32 * 1024 * 1024,
        ),
    )(item_rep_t, user_rep_t, item_emb_t, user_emb_t, w_eff, b_eff)

    out = out_row[0, :B].reshape(B, 1)
    # torch .squeeze(0): only drops dim 0 if it is size 1 (no-op for B > 1).
    if out.shape[0] == 1:
        out = jnp.squeeze(out, axis=0)
    return out


if __name__ == "__main__":
    # Small, module-consistent shapes.
    B = 2                 # batch
    H = 32                # hidden_size
    K = 64                # latentK (module default)
    n_items, n_users = 10, 10

    key = jax.random.PRNGKey(0)
    keys = jax.random.split(key, 12)

    item_rep = jax.random.normal(keys[0], (B, H), dtype=jnp.float32)
    user_rep = jax.random.normal(keys[1], (B, H), dtype=jnp.float32)
    item_index = jax.random.randint(keys[2], (B,), 0, n_items)
    user_index = jax.random.randint(keys[3], (B,), 0, n_users)

    item_emb_table = jax.random.normal(keys[4], (n_items, H), dtype=jnp.float32)
    user_emb_table = jax.random.normal(keys[5], (n_users, H), dtype=jnp.float32)

    # Linear params; stored as (in_features, out_features).
    def lin_init(kw, kb, fin, fout):
        bound = 1.0 / (fin ** 0.5)
        w = jax.random.uniform(kw, (fin, fout), jnp.float32, -bound, bound)
        b = jax.random.uniform(kb, (fout,), jnp.float32, -bound, bound)
        return w, b

    w1, b1 = lin_init(keys[6], keys[7], 3 * H, 2 * K)   # fc_doubleK
    w2, b2 = lin_init(keys[8], keys[9], 2 * K, K)       # fc_singleK
    w3, b3 = lin_init(keys[10], keys[11], K, 1)         # fc_out
    # TODO(synk): fc_nll_out (the 'nll' branch) is dead code in forward() and is not implemented.

    out = multifc_forward(item_rep, user_rep, item_index, user_index,
                          item_emb_table, user_emb_table,
                          w1, b1, w2, b2, w3, b3)
    out = jax.block_until_ready(out)

    # True f32, uncollapsed reference (matches the PyTorch module in eval /
    # dropout=0). Tolerance covers the bf16 activation streaming only.
    elm = item_emb_table[item_index] * user_emb_table[user_index]
    rep = jnp.concatenate([item_rep, user_rep, elm], axis=1)
    h1 = rep @ w1 + b1
    h2 = h1 @ w2 + b2
    ref = jax.nn.sigmoid(h2 @ w3 + b3)

    assert out.shape == (B, 1), out.shape
    assert jnp.allclose(out, ref, atol=2e-3, rtol=2e-3), \
        float(jnp.max(jnp.abs(out - ref)))

    print("KERNEL_OK")
</pallas_src>

<mosaic_0001>
module attributes {stable_mosaic.version = 11 : i64} {
  func.func @multifc_kernel(%arg0: i32, %arg1: memref<32x128xbf16, #tpu.memory_space<vmem>>, %arg2: memref<32x128xbf16, #tpu.memory_space<vmem>>, %arg3: memref<32x128xbf16, #tpu.memory_space<vmem>>, %arg4: memref<32x128xbf16, #tpu.memory_space<vmem>>, %arg5: memref<96x1xf32, #tpu.memory_space<vmem>>, %arg6: memref<1xf32, #tpu.memory_space<smem>>, %arg7: memref<1x128xf32, #tpu.memory_space<vmem>>) attributes {dimension_semantics = [#tpu.dimension_semantics<parallel>], iteration_bounds = array<i64: 1>, scalar_prefetch = 0 : i64, scratch_operands = 0 : i64, tpu.core_type = #tpu.core_type<tc>, window_params = [{transform_indices = @transform_0, window_bounds = array<i64: 32, 128>}, {transform_indices = @transform_1, window_bounds = array<i64: 32, 128>}, {transform_indices = @transform_2, window_bounds = array<i64: 32, 128>}, {transform_indices = @transform_3, window_bounds = array<i64: 32, 128>}, {pipeline_mode = #tpu.pipeline_mode<synchronous>, transform_indices = @transform_4, window_bounds = array<i64: 96, 1>}, {transform_indices = @transform_5, window_bounds = array<i64: 1>}, {transform_indices = @transform_6, window_bounds = array<i64: 1, 128>}]} {
    %c0 = arith.constant 0 : index
    %c0_0 = arith.constant 0 : index
    %0 = vector.load %arg1[%c0, %c0_0] : memref<32x128xbf16, #tpu.memory_space<vmem>>, vector<32x128xbf16>
    %1 = arith.extf %0 : vector<32x128xbf16> to vector<32x128xf32>
    %c0_1 = arith.constant 0 : index
    %c0_2 = arith.constant 0 : index
    %2 = vector.load %arg2[%c0_1, %c0_2] : memref<32x128xbf16, #tpu.memory_space<vmem>>, vector<32x128xbf16>
    %3 = arith.extf %2 : vector<32x128xbf16> to vector<32x128xf32>
    %c0_3 = arith.constant 0 : index
    %c0_4 = arith.constant 0 : index
    %4 = vector.load %arg3[%c0_3, %c0_4] : memref<32x128xbf16, #tpu.memory_space<vmem>>, vector<32x128xbf16>
    %5 = arith.extf %4 : vector<32x128xbf16> to vector<32x128xf32>
    %c0_5 = arith.constant 0 : index
    %c0_6 = arith.constant 0 : index
    %6 = vector.load %arg4[%c0_5, %c0_6] : memref<32x128xbf16, #tpu.memory_space<vmem>>, vector<32x128xbf16>
    %7 = arith.extf %6 : vector<32x128xbf16> to vector<32x128xf32>
    %8 = arith.mulf %5, %7 : vector<32x128xf32>
    %c0_7 = arith.constant 0 : index
    %c0_8 = arith.constant 0 : index
    %9 = vector.load %arg5[%c0_7, %c0_8] : memref<96x1xf32, #tpu.memory_space<vmem>>, vector<32x1xf32>
    %c32 = arith.constant 32 : index
    %c0_9 = arith.constant 0 : index
    %10 = vector.load %arg5[%c32, %c0_9] : memref<96x1xf32, #tpu.memory_space<vmem>>, vector<32x1xf32>
    %c64 = arith.constant 64 : index
    %c0_10 = arith.constant 0 : index
    %11 = vector.load %arg5[%c64, %c0_10] : memref<96x1xf32, #tpu.memory_space<vmem>>, vector<32x1xf32>
    %12 = vector.broadcast %9 : vector<32x1xf32> to vector<32x128xf32>
    %13 = arith.mulf %1, %12 : vector<32x128xf32>
    %14 = vector.broadcast %10 : vector<32x1xf32> to vector<32x128xf32>
    %15 = arith.mulf %3, %14 : vector<32x128xf32>
    %16 = arith.addf %13, %15 : vector<32x128xf32>
    %17 = vector.broadcast %11 : vector<32x1xf32> to vector<32x128xf32>
    %18 = arith.mulf %8, %17 : vector<32x128xf32>
    %19 = arith.addf %16, %18 : vector<32x128xf32>
    %cst = arith.constant dense<0.000000e+00> : vector<128xf32>
    %20 = vector.multi_reduction <add>, %19, %cst [0] : vector<32x128xf32> to vector<128xf32>
    %21 = vector.shape_cast %20 : vector<128xf32> to vector<1x128xf32>
    %c0_11 = arith.constant 0 : index
    %22 = memref.load %arg6[%c0_11] : memref<1xf32, #tpu.memory_space<smem>>
    %23 = vector.broadcast %22 : f32 to vector<1x128xf32>
    %24 = arith.addf %21, %23 : vector<1x128xf32>
    %25 = arith.negf %24 : vector<1x128xf32>
    %26 = math.exp %25 : vector<1x128xf32>
    %cst_12 = arith.constant 1.000000e+00 : f32
    %27 = vector.broadcast %cst_12 : f32 to vector<1x128xf32>
    %28 = arith.addf %27, %26 : vector<1x128xf32>
    %29 = arith.divf %27, %28 : vector<1x128xf32>
    %c0_13 = arith.constant 0 : index
    %c0_14 = arith.constant 0 : index
    %30 = vector.load %arg7[%c0_13, %c0_14] : memref<1x128xf32, #tpu.memory_space<vmem>>, vector<1x128xf32>
    tpu.vector_store %arg7[%c0_13, %c0_14], %29 {strides = array<i32>} : memref<1x128xf32, #tpu.memory_space<vmem>>, vector<1x128xf32>,
    return
  }
  func.func @transform_0(%arg0: i32) -> (i32, i32) {
    %c0_i32 = arith.constant 0 : i32
    %c0_i32_0 = arith.constant 0 : i32
    return %c0_i32, %arg0 : i32, i32
  }
  func.func @transform_1(%arg0: i32) -> (i32, i32) {
    %c0_i32 = arith.constant 0 : i32
    %c0_i32_0 = arith.constant 0 : i32
    return %c0_i32, %arg0 : i32, i32
  }
  func.func @transform_2(%arg0: i32) -> (i32, i32) {
    %c0_i32 = arith.constant 0 : i32
    %c0_i32_0 = arith.constant 0 : i32
    return %c0_i32, %arg0 : i32, i32
  }
  func.func @transform_3(%arg0: i32) -> (i32, i32) {
    %c0_i32 = arith.constant 0 : i32
    %c0_i32_0 = arith.constant 0 : i32
    return %c0_i32, %arg0 : i32, i32
  }
  func.func @transform_4(%arg0: i32) -> (i32, i32) {
    %c0_i32 = arith.constant 0 : i32
    %c0_i32_0 = arith.constant 0 : i32
    %c0_i32_1 = arith.constant 0 : i32
    return %c0_i32, %c0_i32_0 : i32, i32
  }
  func.func @transform_5(%arg0: i32) -> i32 {
    %c0_i32 = arith.constant 0 : i32
    %c0_i32_0 = arith.constant 0 : i32
    return %c0_i32 : i32
  }
  func.func @transform_6(%arg0: i32) -> (i32, i32) {
    %c0_i32 = arith.constant 0 : i32
    %c0_i32_0 = arith.constant 0 : i32
    return %c0_i32, %arg0 : i32, i32
  }
}

</mosaic_0001>

<bundles_post_ra>
// kernel: multifc_forward.1
= control target key start
LH: loop header
LB: loop body
LE: loop exit
PB: predicated region body
PF: predicated region fallthrough
CT: control target
= control target key end

     0   :  { %v219_v0 = vmov 0   ;;  %s321_s4 = inlined_call_operand.vmem [shape: f32[96,1], index: 4, kind: input, shape index: {}]   ;;  %s322_s2 = inlined_call_operand.vmem [shape: bf16[32,128], index: 2, kind: input, shape index: {}]   ;;  %s323_s3 = inlined_call_operand.vmem [shape: bf16[32,128], index: 3, kind: input, shape index: {}]   ;;  %s324_s1 = inlined_call_operand.vmem [shape: bf16[32,128], index: 1, kind: input, shape index: {}]   ;;  %s325_s0 = inlined_call_operand.vmem [shape: bf16[32,128], index: 0, kind: input, shape index: {}]   ;;  %s326_s5 = inlined_call_operand.<no memory space> [shape: f32[1], index: 5, kind: input, shape index: {}]   ;;  %s327_s6 = inlined_call_operand.vmem [shape: f32[1,128], index: 6, kind: output, shape index: {}]  }
   0x1   :  { %214 = vset.pattern.permute.xlu1 %v219_v0  ;;  %213 = vset.pattern.permute.xlu0 %v219_v0  ;;  %v64_v1 = vld [vmem:[%s321_s4 + $0x20] sm:$0xff]  ;;  %v65_v3 = vld [vmem:[%s321_s4 + $0x28] sm:$0xff]  ;;  %v66_v5 = vld [vmem:[%s321_s4 + $0x30] sm:$0xff] }
   0x2   :  { %v60_v2 = vld [vmem:[%s321_s4] sm:$0xff]  ;;  %98 = vperm.xlu1 %214, %v64_v1   ;;  %v61_v4 = vld [vmem:[%s321_s4 + $0x8] sm:$0xff]  ;;  %v62_v6 = vld [vmem:[%s321_s4 + $0x10] sm:$0xff] }
   0x3   :  { %74 = vperm.xlu0 %213, %v60_v2   ;;  %v69_v7 = vld [vmem:[%s321_s4 + $0x48] sm:$0xff]  ;;  %v68_v8 = vld [vmem:[%s321_s4 + $0x40] sm:$0xff]  ;;  %v67_v9 = vld [vmem:[%s321_s4 + $0x38] sm:$0xff] }
   0x4   :  { %v63_v10 = vld [vmem:[%s321_s4 + $0x18] sm:$0xff]  ;;  %v70_v12 = vld [vmem:[%s321_s4 + $0x50] sm:$0xff]  ;;  %v193_v17 = vld [vmem:[%s322_s2] sm:$0xff]  }
   0x5   :  { %v71_v11 = vld [vmem:[%s321_s4 + $0x58] sm:$0xff]  ;;  %v201_v18 = vld [vmem:[%s323_s3] sm:$0xff]   ;;  %v195_v21 = vunpack.c.h.bf16 %v193_v17  ;;  %v194_v23 = vunpack.c.l.bf16 %v193_v17  ;;  %v209_v26 = vld [vmem:[%s324_s1 + $0x8] sm:$0xff]   ;;  %v162_v17 = vstv %s326_s5 }
   0x6   :  { %103 = vperm.xlu1 %214, %v65_v3   ;;  %v185_v19 = vld [vmem:[%s324_s1] sm:$0xff]   ;;  %v203_v22 = vunpack.c.h.bf16 %v201_v18  ;;  %v202_v24 = vunpack.c.l.bf16 %v201_v18  ;;  %v208_v28 = vld [vmem:[%s325_s0 + $0x8] sm:$0xff]   ;;  %v190_v35 = vunpack.c.l.bf16 %v209_v26  ;;  %v191_v51 = vunpack.c.h.bf16 %v209_v26 }
   0x7   :  { %79 = vperm.xlu0 %213, %v61_v4   ;;  %v177_v20 = vld [vmem:[%s325_s0] sm:$0xff]   ;;  %v186_v29 = vunpack.c.l.bf16 %v185_v19  ;;  %v187_v31 = vunpack.c.h.bf16 %v185_v19  ;;  %v210_v33 = vld [vmem:[%s322_s2 + $0x8] sm:$0xff]   ;;  %v182_v36 = vunpack.c.l.bf16 %v208_v28  ;;  %v183_v52 = vunpack.c.h.bf16 %v208_v28 }
   0x8   :  { %v178_v30 = vunpack.c.l.bf16 %v177_v20  ;;  %v179_v32 = vunpack.c.h.bf16 %v177_v20  ;;  %v211_v34 = vld [vmem:[%s323_s3 + $0x8] sm:$0xff]   ;;  %v57_v37 = vmul.f32 %v203_v22, %v195_v21  ;;  %v56_v38 = vmul.f32 %v202_v24, %v194_v23 }
   0x9   :  { %v199_v41 = vunpack.c.h.bf16 %v210_v33  ;;  %v207_v42 = vunpack.c.h.bf16 %v211_v34  ;;  %v198_v43 = vunpack.c.l.bf16 %v210_v33  ;;  %v206_v44 = vunpack.c.l.bf16 %v211_v34 }
   0xa   :  { %108 = vperm.xlu1 %214, %v66_v5  }
   0xb   :  { %84 = vperm.xlu0 %213, %v62_v6   ;;  %v59_v55 = vmul.f32 %v207_v42, %v199_v41  ;;  %v58_v56 = vmul.f32 %v206_v44, %v198_v43 }
   0xe   :  { %131 = vperm.xlu1 %214, %v69_v7  }
   0xf   :  { %126 = vperm.xlu0 %213, %v68_v8  }
  0x12   :  { %113 = vperm.xlu1 %214, %v67_v9  }
  0x13   :  { %89 = vperm.xlu0 %213, %v63_v10  }
  0x16   :  { %141 = vperm.xlu1 %214, %v71_v11  }
  0x17   :  { %136 = vperm.xlu0 %213, %v70_v12  }
  0x7d   :  { %v99_v13 = vpop.permute.xlu1 %98 }
  0x7e   :  { %v75_v14 = vpop.permute.xlu0 %74  ;;  %v116_v45 = vmul.f32 %v186_v29, %v99_v13 }
  0x7f   :  { %v92_v46 = vmul.f32 %v178_v30, %v75_v14 }
  0x81   :  { %v104_v15 = vpop.permute.xlu1 %103  ;;  %v120_v57 = vadd.f32 %v116_v45, %v92_v46 }
  0x82   :  { %v80_v16 = vpop.permute.xlu0 %79  ;;  %v117_v47 = vmul.f32 %v187_v31, %v104_v15 }
  0x83   :  { %v93_v48 = vmul.f32 %v179_v32, %v80_v16 }
  0x85   :  { %v109_v25 = vpop.permute.xlu1 %108  ;;  %v121_v58 = vadd.f32 %v117_v47, %v93_v48 }
  0x86   :  { %v85_v27 = vpop.permute.xlu0 %84  ;;  %v118_v59 = vmul.f32 %v190_v35, %v109_v25 }
  0x87   :  { %v94_v60 = vmul.f32 %v182_v36, %v85_v27 }
  0x89   :  { %v132_v39 = vpop.permute.xlu1 %131  ;;  %v122_v3 = vadd.f32 %v118_v59, %v94_v60 }
  0x8a   :  { %v127_v40 = vpop.permute.xlu0 %126  ;;  %v145_v49 = vmul.f32 %v132_v39, %v57_v37 }
  0x8b   :  { %v144_v50 = vmul.f32 %v127_v40, %v56_v38 }
  0x8c   :  { %v149_v61 = vadd.f32 %v145_v49, %v121_v58 }
  0x8d   :  { %v114_v53 = vpop.permute.xlu1 %113  ;;  %v148_v62 = vadd.f32 %v144_v50, %v120_v57 }
  0x8e   :  { %v90_v54 = vpop.permute.xlu0 %89  ;;  %v119_v63 = vmul.f32 %v191_v51, %v114_v53 }
  0x8f   :  { %v95_v0 = vmul.f32 %v183_v52, %v90_v54  ;;  %v152_v6 = vadd.f32 %v149_v61, %v148_v62 }
  0x91   :  { %v142_v1 = vpop.permute.xlu1 %141  ;;  %v123_v7 = vadd.f32 %v119_v63, %v95_v0 }
  0x92   :  { %v137_v2 = vpop.permute.xlu0 %136  ;;  %v147_v4 = vmul.f32 %v142_v1, %v59_v55 }
  0x93   :  { %v146_v5 = vmul.f32 %v137_v2, %v58_v56 }
  0x94   :  { %v151_v9 = vadd.f32 %v147_v4, %v123_v7 }
  0x95   :  { %v150_v8 = vadd.f32 %v146_v5, %v122_v3 }
  0x97   :  { %v153_v10 = vadd.f32 %v152_v6, %v150_v8 }
  0x99   :  { %v154_v11 = vadd.f32 %v153_v10, %v151_v9 }
  0x9b   :  { %v155_v12 = vrot.slane %v154_v11, 4 }
  0x9d   :  { %v156_v13 = vadd.f32 %v155_v12, %v154_v11 }
  0x9f   :  { %v157_v14 = vrot.slane %v156_v13, 2 }
  0xa1   :  { %v158_v15 = vadd.f32 %v157_v14, %v156_v13 }
  0xa3   :  { %v159_v16 = vrot.slane %v158_v15, 1 }
  0xa5   :  { %v160_v18 = vadd.f32 %v159_v16, %v158_v15 }
  0xa7   :  { %v163_v19 = vadd.f32 %v162_v17, %v160_v18 }
  0xa9   :  { %v175_v20 = vmul.f32 -1.442695, %v163_v19 }
  0xab   :  { %215 = vpow2.f32 %v175_v20 }
  0xb8   :  { %v216_v21 = vpop.eup %215 }
  0xb9   :  { %v167_v22 = vadd.f32 1.0, %v216_v21 }
  0xbb   :  { %217 = vrcp.f32 %v167_v22 }
  0xc8   :  { %v218_v23 = vpop.eup %217 }
  0xc9   :  { %170 = vst [vmem:[%s327_s6] sm:$0x1] %v218_v23 }

</bundles_post_ra>
